<compile_context>
chip_gen: v7x
topology: tpu7x:2x2x1
jax: 0.10.0
libtpu: 0.0.40
codegen_flags: <defaults>
</compile_context>

<pallas_src>
import functools
import math

import jax
import jax.numpy as jnp
from jax import lax
from jax.experimental import pallas as pl
from jax.experimental.pallas import tpu as pltpu

LANES = 128      # f32 vreg lane width
SUBLANES = 8     # f32 vreg sublane width
_UNROLL = 8      # rows per fori_loop iteration (static inner unroll)


def _round_up(x, m):
    return ((x + m - 1) // m) * m


def _cdiv(a, b):
    return -(-a // b)


def _mlp_kernel(x_ref, w0_ref, b0_ref, w1_ref, b1_ref, o_ref, *, activation, rows):
    # x_ref : (R, 128)    R rows of 128 batch scalars (batch on the lane axis)
    # w0_ref: (Hp, 128)   layer-0 weight, hidden on sublanes, lane-replicated (resident)
    # b0_ref: (Hp, 128)   layer-0 bias, lane-replicated                       (resident)
    # w1_ref: (Hp, 128)   layer-1 weight, lane-replicated, zero in padding    (resident)
    # b1_ref: (1, 128)    layer-1 bias, lane-replicated                       (resident)
    # o_ref : (R, 128)    packed outputs for the 128*R batch elements of this tile

    # Hoist the resident parameter tiles out of the row loop.
    w0 = w0_ref[...]
    b0 = b0_ref[...]
    w1 = w1_ref[...]
    b1 = b1_ref[...]

    def compute_row(r):
        # One row = 128 batch elements.
        xr = x_ref[pl.ds(r, 1), :]                    # (1, 128)
        h = xr * w0 + b0                              # (Hp, 128)  VPU outer product
        if activation == "relu":
            h = jnp.maximum(h, 0.0)
        elif activation == "tanh":
            h = jnp.tanh(h)                           # EUP
        elif activation == "sigmoid":
            h = jax.nn.sigmoid(h)                     # EUP
        else:
            raise ValueError(f"unsupported activation: {activation}")
        # Layer 1 (N == 1): VPU multiply + tree-add over the hidden axis.
        y = jnp.sum(h * w1, axis=0, keepdims=True) + b1   # (1, 128)
        o_ref[pl.ds(r, 1), :] = y.astype(o_ref.dtype)

    def group(g, carry):
        base = pl.multiple_of(g * _UNROLL, _UNROLL)
        for s in range(_UNROLL):                      # static unroll inside the loop
            compute_row(base + s)
        return carry

    lax.fori_loop(0, rows // _UNROLL, group, 0)


def mlp_forward(x, w0, b0, w1, b1, *, activation="relu", block_rows=None):
    """Forward pass of the single-hidden-layer MLP (module defaults).

    x  : (B, 1)      float32
    w0 : (1, H)      layer-0 weight, [in, out] layout
    b0 : (1, H)
    w1 : (H, 1)      layer-1 weight, [in, out] layout
    b1 : (1, 1)
    """
    B, d_in = x.shape
    H = w0.shape[1]
    d_out = w1.shape[1]
    assert d_in == 1 and d_out == 1, "kernel specialized for the module defaults"
    # TODO(synk): generalize to inputs>1 / outputs>1 / >1 hidden layer / ensembles.

    h_pad = _round_up(max(H, SUBLANES), SUBLANES)

    # ---- batch tile selection (rows of 128 batch elements each) ----
    if block_rows is None:
        nb_needed = _cdiv(B, LANES)
        if nb_needed <= SUBLANES:
            block_rows = SUBLANES
        else:
            # Cap tiles at 256 rows (32K batch, ~128 KiB per buffer) and keep
            # >=2 grid steps so v7x's second TensorCore gets work.
            block_rows = min(256, _round_up(_cdiv(nb_needed, 2), SUBLANES))
    block_rows = max(SUBLANES, _round_up(int(block_rows), SUBLANES))

    tile_batch = block_rows * LANES
    b_pad = _round_up(B, tile_batch)
    nb = b_pad // LANES
    grid = (nb // block_rows,)

    # ---- pack the batch onto the lane axis: element b -> (b // 128, b % 128) ----
    x_flat = jnp.zeros((b_pad,), jnp.float32).at[:B].set(x[:, 0].astype(jnp.float32))
    x_packed = x_flat.reshape(nb, LANES)

    # ---- lane-replicate parameters; hidden sits on the sublane axis ----
    # Zero-padding H -> h_pad is exact: padded w1 rows are 0, so act(pad) * 0 == 0.
    w0_rep = jnp.zeros((h_pad, LANES), jnp.float32).at[:H, :].set(
        jnp.broadcast_to(w0[0, :, None].astype(jnp.float32), (H, LANES)))
    b0_rep = jnp.zeros((h_pad, LANES), jnp.float32).at[:H, :].set(
        jnp.broadcast_to(b0[0, :, None].astype(jnp.float32), (H, LANES)))
    w1_rep = jnp.zeros((h_pad, LANES), jnp.float32).at[:H, :].set(
        jnp.broadcast_to(w1[:, 0][:, None].astype(jnp.float32), (H, LANES)))
    b1_rep = jnp.broadcast_to(b1[:1, :1].astype(jnp.float32), (1, LANES))

    kernel = functools.partial(_mlp_kernel, activation=activation, rows=block_rows)

    out = pl.pallas_call(
        kernel,
        out_shape=jax.ShapeDtypeStruct((nb, LANES), jnp.float32),
        grid_spec=pltpu.PrefetchScalarGridSpec(
            num_scalar_prefetch=0,
            grid=grid,
            in_specs=[
                pl.BlockSpec((block_rows, LANES), lambda i: (i, 0)),  # x: streamed
                pl.BlockSpec((h_pad, LANES), lambda i: (0, 0)),       # w0: resident
                pl.BlockSpec((h_pad, LANES), lambda i: (0, 0)),       # b0: resident
                pl.BlockSpec((h_pad, LANES), lambda i: (0, 0)),       # w1: resident
                pl.BlockSpec((1, LANES), lambda i: (0, 0)),           # b1: resident
            ],
            out_specs=pl.BlockSpec((block_rows, LANES), lambda i: (i, 0)),
        ),
        compiler_params=pltpu.CompilerParams(
            dimension_semantics=("parallel",)),
    )(x_packed, w0_rep, b0_rep, w1_rep, b1_rep)

    # Unpack (nb, 128) -> (B, 1): packing matches the input packing, so this is
    # a cheap row-major reshape + slice (4 B per element of traffic).
    return out.reshape(b_pad, 1)[:B]


def init_linear_params(key, fan_in, fan_out):
    """Deterministic init mimicking torch.nn.Linear default (+/- 1/sqrt(fan_in))."""
    kw, kb = jax.random.split(key)
    bound = 1.0 / math.sqrt(fan_in)
    # Stored as [in, out] so the forward does x @ W directly.
    w = jax.random.uniform(kw, (fan_in, fan_out), jnp.float32, -bound, bound)
    b = jax.random.uniform(kb, (1, fan_out), jnp.float32, -bound, bound)
    return w, b


def reference_forward(x, w0, b0, w1, b1, activation="relu"):
    if activation == "relu":
        act = lambda v: jnp.maximum(v, 0.0)
    elif activation == "tanh":
        act = jnp.tanh
    else:
        act = jax.nn.sigmoid
    h = act(x @ w0 + b0)
    return h @ w1 + b1


if __name__ == "__main__":
    # Module defaults: inputs=1, hidden_layers=[100], outputs=1, activation='relu'
    D_IN, HIDDEN, D_OUT = 1, 100, 1

    key = jax.random.PRNGKey(0)
    k_x, k_l0, k_l1, k_x2 = jax.random.split(key, 4)

    w0, b0 = init_linear_params(k_l0, D_IN, HIDDEN)
    w1, b1 = init_linear_params(k_l1, HIDDEN, D_OUT)

    # Small batch (single grid step).
    x = jax.random.normal(k_x, (8, D_IN), jnp.float32)
    out = jax.block_until_ready(mlp_forward(x, w0, b0, w1, b1))
    ref = reference_forward(x, w0, b0, w1, b1)
    assert out.shape == (8, D_OUT)
    assert jnp.allclose(out, ref, atol=1e-5, rtol=1e-5), "mismatch vs reference (B=8)"

    # Slightly larger batch: exercises batch padding + a 2-step "parallel" grid.
    x2 = jax.random.normal(k_x2, (2500, D_IN), jnp.float32)
    out2 = jax.block_until_ready(mlp_forward(x2, w0, b0, w1, b1))
    ref2 = reference_forward(x2, w0, b0, w1, b1)
    assert out2.shape == (2500, D_OUT)
    assert jnp.allclose(out2, ref2, atol=1e-5, rtol=1e-5), "mismatch vs reference (B=2500)"

    print("KERNEL_OK")
</pallas_src>

<mosaic_0001>
module attributes {stable_mosaic.version = 11 : i64} {
  func.func @_mlp_kernel(%arg0: i32, %arg1: memref<8x128xf32, #tpu.memory_space<vmem>>, %arg2: memref<104x128xf32, #tpu.memory_space<vmem>>, %arg3: memref<104x128xf32, #tpu.memory_space<vmem>>, %arg4: memref<104x128xf32, #tpu.memory_space<vmem>>, %arg5: memref<1x128xf32, #tpu.memory_space<vmem>>, %arg6: memref<8x128xf32, #tpu.memory_space<vmem>>) attributes {dimension_semantics = [#tpu.dimension_semantics<parallel>], iteration_bounds = array<i64: 1>, scalar_prefetch = 0 : i64, scratch_operands = 0 : i64, tpu.core_type = #tpu.core_type<tc>, window_params = [{transform_indices = @transform_0, window_bounds = array<i64: 8, 128>}, {pipeline_mode = #tpu.pipeline_mode<synchronous>, transform_indices = @transform_1, window_bounds = array<i64: 104, 128>}, {pipeline_mode = #tpu.pipeline_mode<synchronous>, transform_indices = @transform_2, window_bounds = array<i64: 104, 128>}, {pipeline_mode = #tpu.pipeline_mode<synchronous>, transform_indices = @transform_3, window_bounds = array<i64: 104, 128>}, {pipeline_mode = #tpu.pipeline_mode<synchronous>, transform_indices = @transform_4, window_bounds = array<i64: 1, 128>}, {transform_indices = @transform_5, window_bounds = array<i64: 8, 128>}]} {
    %c0 = arith.constant 0 : index
    %c0_0 = arith.constant 0 : index
    %0 = vector.load %arg2[%c0, %c0_0] : memref<104x128xf32, #tpu.memory_space<vmem>>, vector<104x128xf32>
    %c0_1 = arith.constant 0 : index
    %c0_2 = arith.constant 0 : index
    %1 = vector.load %arg3[%c0_1, %c0_2] : memref<104x128xf32, #tpu.memory_space<vmem>>, vector<104x128xf32>
    %c0_3 = arith.constant 0 : index
    %c0_4 = arith.constant 0 : index
    %2 = vector.load %arg4[%c0_3, %c0_4] : memref<104x128xf32, #tpu.memory_space<vmem>>, vector<104x128xf32>
    %c0_5 = arith.constant 0 : index
    %c0_6 = arith.constant 0 : index
    %3 = vector.load %arg5[%c0_5, %c0_6] : memref<1x128xf32, #tpu.memory_space<vmem>>, vector<1x128xf32>
    %c0_i32 = arith.constant 0 : i32
    %c8_i32 = arith.constant 8 : i32
    %4 = arith.muli %c0_i32, %c8_i32 : i32
    %5 = tpu.assume_multiple %4, 8 : i32
    %c0_i32_7 = arith.constant 0 : i32
    %6 = arith.addi %5, %c0_i32_7 : i32
    %7 = arith.index_cast %6 : i32 to index
    %c0_8 = arith.constant 0 : index
    %8 = vector.load %arg1[%7, %c0_8] : memref<8x128xf32, #tpu.memory_space<vmem>>, vector<1x128xf32>
    %9 = vector.broadcast %8 : vector<1x128xf32> to vector<104x128xf32>
    %10 = arith.mulf %9, %0 : vector<104x128xf32>
    %11 = arith.addf %10, %1 : vector<104x128xf32>
    %cst = arith.constant 0.000000e+00 : f32
    %12 = vector.broadcast %cst : f32 to vector<104x128xf32>
    %13 = arith.maximumf %11, %12 : vector<104x128xf32>
    %14 = arith.mulf %13, %2 : vector<104x128xf32>
    %cst_9 = arith.constant dense<0.000000e+00> : vector<128xf32>
    %15 = vector.multi_reduction <add>, %14, %cst_9 [0] : vector<104x128xf32> to vector<128xf32>
    %16 = vector.shape_cast %15 : vector<128xf32> to vector<1x128xf32>
    %17 = arith.addf %16, %3 : vector<1x128xf32>
    %18 = arith.index_cast %6 : i32 to index
    %c0_10 = arith.constant 0 : index
    %19 = vector.load %arg6[%18, %c0_10] : memref<8x128xf32, #tpu.memory_space<vmem>>, vector<1x128xf32>
    tpu.vector_store %arg6[%18, %c0_10], %17 {strides = array<i32>} : memref<8x128xf32, #tpu.memory_space<vmem>>, vector<1x128xf32>,
    %c1_i32 = arith.constant 1 : i32
    %20 = arith.addi %5, %c1_i32 : i32
    %21 = arith.index_cast %20 : i32 to index
    %c0_11 = arith.constant 0 : index
    %22 = vector.load %arg1[%21, %c0_11] : memref<8x128xf32, #tpu.memory_space<vmem>>, vector<1x128xf32>
    %23 = vector.broadcast %22 : vector<1x128xf32> to vector<104x128xf32>
    %24 = arith.mulf %23, %0 : vector<104x128xf32>
    %25 = arith.addf %24, %1 : vector<104x128xf32>
    %cst_12 = arith.constant 0.000000e+00 : f32
    %26 = vector.broadcast %cst_12 : f32 to vector<104x128xf32>
    %27 = arith.maximumf %25, %26 : vector<104x128xf32>
    %28 = arith.mulf %27, %2 : vector<104x128xf32>
    %cst_13 = arith.constant dense<0.000000e+00> : vector<128xf32>
    %29 = vector.multi_reduction <add>, %28, %cst_13 [0] : vector<104x128xf32> to vector<128xf32>
    %30 = vector.shape_cast %29 : vector<128xf32> to vector<1x128xf32>
    %31 = arith.addf %30, %3 : vector<1x128xf32>
    %32 = arith.index_cast %20 : i32 to index
    %c0_14 = arith.constant 0 : index
    %33 = vector.load %arg6[%32, %c0_14] : memref<8x128xf32, #tpu.memory_space<vmem>>, vector<1x128xf32>
    tpu.vector_store %arg6[%32, %c0_14], %31 {strides = array<i32>} : memref<8x128xf32, #tpu.memory_space<vmem>>, vector<1x128xf32>,
    %c2_i32 = arith.constant 2 : i32
    %34 = arith.addi %5, %c2_i32 : i32
    %35 = arith.index_cast %34 : i32 to index
    %c0_15 = arith.constant 0 : index
    %36 = vector.load %arg1[%35, %c0_15] : memref<8x128xf32, #tpu.memory_space<vmem>>, vector<1x128xf32>
    %37 = vector.broadcast %36 : vector<1x128xf32> to vector<104x128xf32>
    %38 = arith.mulf %37, %0 : vector<104x128xf32>
    %39 = arith.addf %38, %1 : vector<104x128xf32>
    %cst_16 = arith.constant 0.000000e+00 : f32
    %40 = vector.broadcast %cst_16 : f32 to vector<104x128xf32>
    %41 = arith.maximumf %39, %40 : vector<104x128xf32>
    %42 = arith.mulf %41, %2 : vector<104x128xf32>
    %cst_17 = arith.constant dense<0.000000e+00> : vector<128xf32>
    %43 = vector.multi_reduction <add>, %42, %cst_17 [0] : vector<104x128xf32> to vector<128xf32>
    %44 = vector.shape_cast %43 : vector<128xf32> to vector<1x128xf32>
    %45 = arith.addf %44, %3 : vector<1x128xf32>
    %46 = arith.index_cast %34 : i32 to index
    %c0_18 = arith.constant 0 : index
    %47 = vector.load %arg6[%46, %c0_18] : memref<8x128xf32, #tpu.memory_space<vmem>>, vector<1x128xf32>
    tpu.vector_store %arg6[%46, %c0_18], %45 {strides = array<i32>} : memref<8x128xf32, #tpu.memory_space<vmem>>, vector<1x128xf32>,
    %c3_i32 = arith.constant 3 : i32
    %48 = arith.addi %5, %c3_i32 : i32
    %49 = arith.index_cast %48 : i32 to index
    %c0_19 = arith.constant 0 : index
    %50 = vector.load %arg1[%49, %c0_19] : memref<8x128xf32, #tpu.memory_space<vmem>>, vector<1x128xf32>
    %51 = vector.broadcast %50 : vector<1x128xf32> to vector<104x128xf32>
    %52 = arith.mulf %51, %0 : vector<104x128xf32>
    %53 = arith.addf %52, %1 : vector<104x128xf32>
    %cst_20 = arith.constant 0.000000e+00 : f32
    %54 = vector.broadcast %cst_20 : f32 to vector<104x128xf32>
    %55 = arith.maximumf %53, %54 : vector<104x128xf32>
    %56 = arith.mulf %55, %2 : vector<104x128xf32>
    %cst_21 = arith.constant dense<0.000000e+00> : vector<128xf32>
    %57 = vector.multi_reduction <add>, %56, %cst_21 [0] : vector<104x128xf32> to vector<128xf32>
    %58 = vector.shape_cast %57 : vector<128xf32> to vector<1x128xf32>
    %59 = arith.addf %58, %3 : vector<1x128xf32>
    %60 = arith.index_cast %48 : i32 to index
    %c0_22 = arith.constant 0 : index
    %61 = vector.load %arg6[%60, %c0_22] : memref<8x128xf32, #tpu.memory_space<vmem>>, vector<1x128xf32>
    tpu.vector_store %arg6[%60, %c0_22], %59 {strides = array<i32>} : memref<8x128xf32, #tpu.memory_space<vmem>>, vector<1x128xf32>,
    %c4_i32 = arith.constant 4 : i32
    %62 = arith.addi %5, %c4_i32 : i32
    %63 = arith.index_cast %62 : i32 to index
    %c0_23 = arith.constant 0 : index
    %64 = vector.load %arg1[%63, %c0_23] : memref<8x128xf32, #tpu.memory_space<vmem>>, vector<1x128xf32>
    %65 = vector.broadcast %64 : vector<1x128xf32> to vector<104x128xf32>
    %66 = arith.mulf %65, %0 : vector<104x128xf32>
    %67 = arith.addf %66, %1 : vector<104x128xf32>
    %cst_24 = arith.constant 0.000000e+00 : f32
    %68 = vector.broadcast %cst_24 : f32 to vector<104x128xf32>
    %69 = arith.maximumf %67, %68 : vector<104x128xf32>
    %70 = arith.mulf %69, %2 : vector<104x128xf32>
    %cst_25 = arith.constant dense<0.000000e+00> : vector<128xf32>
    %71 = vector.multi_reduction <add>, %70, %cst_25 [0] : vector<104x128xf32> to vector<128xf32>
    %72 = vector.shape_cast %71 : vector<128xf32> to vector<1x128xf32>
    %73 = arith.addf %72, %3 : vector<1x128xf32>
    %74 = arith.index_cast %62 : i32 to index
    %c0_26 = arith.constant 0 : index
    %75 = vector.load %arg6[%74, %c0_26] : memref<8x128xf32, #tpu.memory_space<vmem>>, vector<1x128xf32>
    tpu.vector_store %arg6[%74, %c0_26], %73 {strides = array<i32>} : memref<8x128xf32, #tpu.memory_space<vmem>>, vector<1x128xf32>,
    %c5_i32 = arith.constant 5 : i32
    %76 = arith.addi %5, %c5_i32 : i32
    %77 = arith.index_cast %76 : i32 to index
    %c0_27 = arith.constant 0 : index
    %78 = vector.load %arg1[%77, %c0_27] : memref<8x128xf32, #tpu.memory_space<vmem>>, vector<1x128xf32>
    %79 = vector.broadcast %78 : vector<1x128xf32> to vector<104x128xf32>
    %80 = arith.mulf %79, %0 : vector<104x128xf32>
    %81 = arith.addf %80, %1 : vector<104x128xf32>
    %cst_28 = arith.constant 0.000000e+00 : f32
    %82 = vector.broadcast %cst_28 : f32 to vector<104x128xf32>
    %83 = arith.maximumf %81, %82 : vector<104x128xf32>
    %84 = arith.mulf %83, %2 : vector<104x128xf32>
    %cst_29 = arith.constant dense<0.000000e+00> : vector<128xf32>
    %85 = vector.multi_reduction <add>, %84, %cst_29 [0] : vector<104x128xf32> to vector<128xf32>
    %86 = vector.shape_cast %85 : vector<128xf32> to vector<1x128xf32>
    %87 = arith.addf %86, %3 : vector<1x128xf32>
    %88 = arith.index_cast %76 : i32 to index
    %c0_30 = arith.constant 0 : index
    %89 = vector.load %arg6[%88, %c0_30] : memref<8x128xf32, #tpu.memory_space<vmem>>, vector<1x128xf32>
    tpu.vector_store %arg6[%88, %c0_30], %87 {strides = array<i32>} : memref<8x128xf32, #tpu.memory_space<vmem>>, vector<1x128xf32>,
    %c6_i32 = arith.constant 6 : i32
    %90 = arith.addi %5, %c6_i32 : i32
    %91 = arith.index_cast %90 : i32 to index
    %c0_31 = arith.constant 0 : index
    %92 = vector.load %arg1[%91, %c0_31] : memref<8x128xf32, #tpu.memory_space<vmem>>, vector<1x128xf32>
    %93 = vector.broadcast %92 : vector<1x128xf32> to vector<104x128xf32>
    %94 = arith.mulf %93, %0 : vector<104x128xf32>
    %95 = arith.addf %94, %1 : vector<104x128xf32>
    %cst_32 = arith.constant 0.000000e+00 : f32
    %96 = vector.broadcast %cst_32 : f32 to vector<104x128xf32>
    %97 = arith.maximumf %95, %96 : vector<104x128xf32>
    %98 = arith.mulf %97, %2 : vector<104x128xf32>
    %cst_33 = arith.constant dense<0.000000e+00> : vector<128xf32>
    %99 = vector.multi_reduction <add>, %98, %cst_33 [0] : vector<104x128xf32> to vector<128xf32>
    %100 = vector.shape_cast %99 : vector<128xf32> to vector<1x128xf32>
    %101 = arith.addf %100, %3 : vector<1x128xf32>
    %102 = arith.index_cast %90 : i32 to index
    %c0_34 = arith.constant 0 : index
    %103 = vector.load %arg6[%102, %c0_34] : memref<8x128xf32, #tpu.memory_space<vmem>>, vector<1x128xf32>
    tpu.vector_store %arg6[%102, %c0_34], %101 {strides = array<i32>} : memref<8x128xf32, #tpu.memory_space<vmem>>, vector<1x128xf32>,
    %c7_i32 = arith.constant 7 : i32
    %104 = arith.addi %5, %c7_i32 : i32
    %105 = arith.index_cast %104 : i32 to index
    %c0_35 = arith.constant 0 : index
    %106 = vector.load %arg1[%105, %c0_35] : memref<8x128xf32, #tpu.memory_space<vmem>>, vector<1x128xf32>
    %107 = vector.broadcast %106 : vector<1x128xf32> to vector<104x128xf32>
    %108 = arith.mulf %107, %0 : vector<104x128xf32>
    %109 = arith.addf %108, %1 : vector<104x128xf32>
    %cst_36 = arith.constant 0.000000e+00 : f32
    %110 = vector.broadcast %cst_36 : f32 to vector<104x128xf32>
    %111 = arith.maximumf %109, %110 : vector<104x128xf32>
    %112 = arith.mulf %111, %2 : vector<104x128xf32>
    %cst_37 = arith.constant dense<0.000000e+00> : vector<128xf32>
    %113 = vector.multi_reduction <add>, %112, %cst_37 [0] : vector<104x128xf32> to vector<128xf32>
    %114 = vector.shape_cast %113 : vector<128xf32> to vector<1x128xf32>
    %115 = arith.addf %114, %3 : vector<1x128xf32>
    %116 = arith.index_cast %104 : i32 to index
    %c0_38 = arith.constant 0 : index
    %117 = vector.load %arg6[%116, %c0_38] : memref<8x128xf32, #tpu.memory_space<vmem>>, vector<1x128xf32>
    tpu.vector_store %arg6[%116, %c0_38], %115 {strides = array<i32>} : memref<8x128xf32, #tpu.memory_space<vmem>>, vector<1x128xf32>,
    %c1_i32_39 = arith.constant 1 : i32
    return
  }
  func.func @transform_0(%arg0: i32) -> (i32, i32) {
    %c0_i32 = arith.constant 0 : i32
    %c0_i32_0 = arith.constant 0 : i32
    return %arg0, %c0_i32 : i32, i32
  }
  func.func @transform_1(%arg0: i32) -> (i32, i32) {
    %c0_i32 = arith.constant 0 : i32
    %c0_i32_0 = arith.constant 0 : i32
    %c0_i32_1 = arith.constant 0 : i32
    return %c0_i32, %c0_i32_0 : i32, i32
  }
  func.func @transform_2(%arg0: i32) -> (i32, i32) {
    %c0_i32 = arith.constant 0 : i32
    %c0_i32_0 = arith.constant 0 : i32
    %c0_i32_1 = arith.constant 0 : i32
    return %c0_i32, %c0_i32_0 : i32, i32
  }
  func.func @transform_3(%arg0: i32) -> (i32, i32) {
    %c0_i32 = arith.constant 0 : i32
    %c0_i32_0 = arith.constant 0 : i32
    %c0_i32_1 = arith.constant 0 : i32
    return %c0_i32, %c0_i32_0 : i32, i32
  }
  func.func @transform_4(%arg0: i32) -> (i32, i32) {
    %c0_i32 = arith.constant 0 : i32
    %c0_i32_0 = arith.constant 0 : i32
    %c0_i32_1 = arith.constant 0 : i32
    return %c0_i32, %c0_i32_0 : i32, i32
  }
  func.func @transform_5(%arg0: i32) -> (i32, i32) {
    %c0_i32 = arith.constant 0 : i32
    %c0_i32_0 = arith.constant 0 : i32
    return %arg0, %c0_i32 : i32, i32
  }
}

</mosaic_0001>

<bundles_post_ra>
// kernel: tpu_custom_call.1
= control target key start
LH: loop header
LB: loop body
LE: loop exit
PB: predicated region body
PF: predicated region fallthrough
CT: control target
= control target key end

     0   :  { %10 = vsyncpa [#allocation3], 0  ;;  %s1529_s0 = inlined_call_operand.hbm [shape: f32[8,128], index: 0, kind: input, shape index: {}]   ;;  %s1530_s1 = inlined_call_operand.hbm [shape: f32[104,128], index: 1, kind: input, shape index: {}]   ;;  %s1531_s2 = inlined_call_operand.hbm [shape: f32[104,128], index: 2, kind: input, shape index: {}]   ;;  %s1532_s3 = inlined_call_operand.hbm [shape: f32[104,128], index: 3, kind: input, shape index: {}]   ;;  %s1533_s4 = inlined_call_operand.vmem [shape: f32[1,128], index: 4, kind: input, shape index: {}]   ;;  %s1534_s5 = inlined_call_operand.hbm [shape: f32[8,128], index: 5, kind: output, shape index: {}]  }
   0x1   :  { %11 = vsyncpa [#allocation6], 0 }
   0x2   :  { %12 = vsyncpa [#allocation9], 0 }
   0x3   :  { %13 = vsyncpa [#allocation4], 0  ;;  %s944_s18 = smov [#allocation5]   ;;  %s826_s22 = scalar_lea.hbm %s1530_s1, 1664 }
   0x4   :  { %s29_s19 = sshll.u32 %s944_s18, 4  ;;  %p827_p0 = scmp.ne.s32.totalorder %s1530_s1, %s826_s22  ;;  %s30_s19 = int_to_ptr.vmem [resolvable:$true] %s29_s19 }
   0x5   :  { %p830_p1 = scmp.lt.u32.totalorder %s826_s22, %s1530_s1 }
   0x7   :  { %p832_p2 = pnand %p830_p1, %p827_p0 }
   0x9   :  { %835 = shalt.err (!%p832_p2)
}
   0xa   :  { %s836_s27 = scalar_lea.vmem %s30_s19, 1664  ;;  %p841_p4 = scmp.lt.s32.totalorder %s30_s19, %s30_s19 }
   0xb   :  { %p837_p3 = scmp.ne.s32.totalorder %s30_s19, %s836_s27  ;;  %p842_p5 = scmp.lt.s32.totalorder %s836_s27, %s836_s27 }
   0xd   :  { %p843_p6 = por %p842_p5, %p841_p4 }
   0xf   :  { %p844_p7 = pnand %p843_p6, %p837_p3 }
  0x11   :  { %847 = shalt.err (!%p844_p7)
}
  0x12   :  { %s945_s28 = smov 128   ;;  %s946_s29 = smov 8  }
  0x13   :  { %35 = dma.hbm_to_vmem [thread:$0]  %s1530_s1, 1664, %s30_s19, [#allocation6], %s945_s28, %s945_s28, %s946_s29  }
  0x14   :  { %s947_s7 = smov [#allocation2]   ;;  %s948_s9 = smov [#allocation7]  }
  0x15   :  { %s20_s8 = sshll.u32 %s947_s7, 4  ;;  %s41_s10 = sshll.u32 %s948_s9, 4  ;;  %s21_s8 = int_to_ptr.vmem [resolvable:$true] %s20_s8  ;;  %s42_s10 = int_to_ptr.vmem [resolvable:$true] %s41_s10 }
  0x16   :  { %s848_s13 = scalar_lea.hbm %s1529_s0, 128 }
  0x17   :  { %p849_p8 = scmp.ne.s32.totalorder %s1529_s0, %s848_s13  ;;  %p852_p9 = scmp.lt.u32.totalorder %s848_s13, %s1529_s0 }
  0x19   :  { %p854_p10 = pnand %p852_p9, %p849_p8 }
  0x1b   :  { %857 = shalt.err (!%p854_p10)
}
  0x1c   :  { %s858_s1 = scalar_lea.vmem %s21_s8, 128  ;;  %p863_p12 = scmp.lt.s32.totalorder %s21_s8, %s21_s8 }
  0x1d   :  { %p859_p11 = scmp.ne.s32.totalorder %s21_s8, %s858_s1  ;;  %p864_p13 = scmp.lt.s32.totalorder %s858_s1, %s858_s1 }
  0x1f   :  { %p865_p0 = por %p864_p13, %p863_p12 }
  0x21   :  { %p866_p1 = pnand %p865_p0, %p859_p11 }
  0x23   :  { %869 = shalt.err (!%p866_p1)
}
  0x24   :  { %23 = dma.hbm_to_vmem [thread:$0]  %s1529_s0, 128, %s21_s8, [#allocation3]  }
  0x25   :  { %s870_s22 = scalar_lea.hbm %s1531_s2, 1664 }
  0x26   :  { %p871_p2 = scmp.ne.s32.totalorder %s1531_s2, %s870_s22  ;;  %p874_p3 = scmp.lt.u32.totalorder %s870_s22, %s1531_s2 }
  0x28   :  { %p876_p4 = pnand %p874_p3, %p871_p2 }
  0x2a   :  { %879 = shalt.err (!%p876_p4)
}
  0x2b   :  { %s880_s27 = scalar_lea.vmem %s42_s10, 1664  ;;  %p885_p6 = scmp.lt.s32.totalorder %s42_s10, %s42_s10 }
  0x2c   :  { %p881_p5 = scmp.ne.s32.totalorder %s42_s10, %s880_s27  ;;  %p886_p7 = scmp.lt.s32.totalorder %s880_s27, %s880_s27 }
  0x2e   :  { %p887_p8 = por %p886_p7, %p885_p6 }
  0x30   :  { %p888_p9 = pnand %p887_p8, %p881_p5 }
  0x32   :  { %891 = shalt.err (!%p888_p9)
}
  0x33   :  { %47 = dma.hbm_to_vmem [thread:$0]  %s1531_s2, 1664, %s42_s10, [#allocation6], %s945_s28, %s945_s28, %s946_s29  }
  0x34   :  { %s949_s6 = smov [#allocation8]   ;;  %s892_s11 = scalar_lea.hbm %s1532_s3, 1664 }
  0x35   :  { %s53_s7 = sshll.u32 %s949_s6, 4  ;;  %p893_p10 = scmp.ne.s32.totalorder %s1532_s3, %s892_s11  ;;  %s54_s7 = int_to_ptr.vmem [resolvable:$true] %s53_s7 }
  0x36   :  { %p896_p11 = scmp.lt.u32.totalorder %s892_s11, %s1532_s3 }
  0x38   :  { %p898_p12 = pnand %p896_p11, %p893_p10 }
  0x3a   :  { %901 = shalt.err (!%p898_p12)
}
  0x3b   :  { %s902_s16 = scalar_lea.vmem %s54_s7, 1664  ;;  %p907_p0 = scmp.lt.s32.totalorder %s54_s7, %s54_s7 }
  0x3c   :  { %p903_p13 = scmp.ne.s32.totalorder %s54_s7, %s902_s16  ;;  %p908_p1 = scmp.lt.s32.totalorder %s902_s16, %s902_s16 }
  0x3e   :  { %p909_p2 = por %p908_p1, %p907_p0 }
  0x40   :  { %p910_p3 = pnand %p909_p2, %p903_p13 }
  0x42   :  { %913 = shalt.err (!%p910_p3)
}
  0x43   :  { %59 = dma.hbm_to_vmem [thread:$0]  %s1532_s3, 1664, %s54_s7, [#allocation9], %s945_s28, %s945_s28, %s946_s29  }
  0x44   :  { %936 = dma.done.wait [#allocation3], 128  }
  0x45   :  { %937 = vsyncadd [#allocation3], 4294967168 }
  0x46   :  { %938 = dma.done.wait [#allocation6], 3328  }
  0x47   :  { %939 = vsyncadd [#allocation6], 4294963968 }
  0x48   :  { %940 = dma.done.wait [#allocation9], 1664  }
  0x49   :  { %941 = vsyncadd [#allocation9], 4294965632  ;;  %v1038_v0 = vld [vmem:[#allocation5] sm:$0xff]  ;;  %v1040_v1 = vld [vmem:[#allocation5 + $0x8] sm:$0xff] }
  0x4a   :  { %v1042_v2 = vld [vmem:[#allocation5 + $0x10] sm:$0xff]  ;;  %v1044_v3 = vld [vmem:[#allocation5 + $0x18] sm:$0xff]  ;;  %v1046_v4 = vld [vmem:[#allocation5 + $0x20] sm:$0xff] }
  0x4b   :  { %1580 = vst [vmem:[#allocation15_spill] sm:$0xff] %v1044_v3  ;;  %1581 = vst [vmem:[#allocation16_spill] sm:$0xff] %v1046_v4  ;;  %v782_v5 = vld [vmem:[#allocation2] ss:$0 sm:$0xff]  ;;  %v1048_v6 = vld [vmem:[#allocation7] sm:$0xff] }
  0x4c   :  { %v1050_v7 = vld [vmem:[#allocation7 + $0x8] sm:$0xff]  ;;  %v1052_v8 = vld [vmem:[#allocation7 + $0x10] sm:$0xff]  ;;  %v119_v9 = vmul.f32 %v782_v5, %v1038_v0  ;;  %v120_v10 = vmul.f32 %v782_v5, %v1040_v1  ;;  %v121_v11 = vmul.f32 %v782_v5, %v1042_v2  ;;  %v1057_v12 = vld [vmem:[#allocation5 + $0x28] sm:$0xff]  ;;  %v122_v13 = vmul.f32 %v782_v5, %v1044_v3 }
  0x4d   :  { %1582 = vst [vmem:[#allocation17_spill] sm:$0xff] %v1052_v8  ;;  %v1060_v14 = vld [vmem:[#allocation7 + $0x18] sm:$0xff]  ;;  %v123_v15 = vmul.f32 %v782_v5, %v1046_v4  ;;  %v1066_v19 = vld [vmem:[#allocation5 + $0x30] sm:$0xff]  ;;  %v1068_v20 = vld [vmem:[#allocation7 + $0x20] sm:$0xff]  ;;  %v124_v21 = vmul.f32 %v782_v5, %v1057_v12 }
  0x4e   :  { %v132_v16 = vadd.f32 %v119_v9, %v1048_v6  ;;  %v133_v17 = vadd.f32 %v120_v10, %v1050_v7  ;;  %v134_v18 = vadd.f32 %v121_v11, %v1052_v8  ;;  %v1071_v22 = vld [vmem:[#allocation5 + $0x38] sm:$0xff]  ;;  %v1073_v23 = vld [vmem:[#allocation5 + $0x40] sm:$0xff]  ;;  %v1075_v24 = vld [vmem:[#allocation7 + $0x28] sm:$0xff]  ;;  %v135_v25 = vadd.f32 %v122_v13, %v1060_v14 }
  0x4f   :  { %1583 = vst [vmem:[#allocation18_spill] sm:$0xff] %v1071_v22  ;;  %1584 = vst [vmem:[#allocation19_spill] sm:$0xff] %v1073_v23  ;;  %v1078_v26 = vld [vmem:[#allocation8] sm:$0xff]  ;;  %v1080_v29 = vld [vmem:[#allocation5 + $0x48] sm:$0xff]  ;;  %v125_v32 = vmul.f32 %v782_v5, %v1066_v19  ;;  %v136_v33 = vadd.f32 %v123_v15, %v1068_v20  ;;  %v126_v38 = vmul.f32 %v782_v5, %v1071_v22 }
  0x50   :  { %v145_v27 = vmax.f32 %v132_v16, 0.0  ;;  %v146_v28 = vmax.f32 %v133_v17, 0.0  ;;  %1585 = vst [vmem:[#allocation20_spill] sm:$0xff] %v1080_v29  ;;  %v1082_v30 = vld [vmem:[#allocation5 + $0x50] sm:$0xff]  ;;  %v1084_v31 = vld [vmem:[#allocation8 + $0x8] sm:$0xff]  ;;  %v147_v34 = vmax.f32 %v134_v18, 0.0  ;;  %v127_v39 = vmul.f32 %v782_v5, %v1073_v23 }
  0x51   :  { %1586 = vst [vmem:[#allocation21_spill] sm:$0xff] %v1082_v30  ;;  %v1088_v35 = vld [vmem:[#allocation5 + $0x58] sm:$0xff]  ;;  %v1092_v37 = vld [vmem:[#allocation8 + $0x10] sm:$0xff]  ;;  %v137_v40 = vadd.f32 %v124_v21, %v1075_v24  ;;  %v1101_v43 = vld [vmem:[#allocation7 + $0x40] sm:$0xff]  ;;  %v148_v44 = vmax.f32 %v135_v25, 0.0  ;;  %v128_v47 = vmul.f32 %v782_v5, %v1080_v29  ;;  %v129_v48 = vmul.f32 %v782_v5, %v1082_v30 }
  0x52   :  { %1587 = vst [vmem:[#allocation22_spill] sm:$0xff] %v1088_v35  ;;  %v1090_v36 = vld [vmem:[#allocation7 + $0x30] sm:$0xff]  ;;  %v1097_v41 = vld [vmem:[#allocation5 + $0x60] sm:$0xff]  ;;  %v158_v45 = vmul.f32 %v145_v27, %v1078_v26  ;;  %v1104_v46 = vld [vmem:[#allocation8 + $0x18] sm:$0xff]  ;;  %v159_v49 = vmul.f32 %v146_v28, %v1084_v31  ;;  %v130_v53 = vmul.f32 %v782_v5, %v1088_v35  ;;  %v149_v55 = vmax.f32 %v136_v33, 0.0 }
  0x53   :  { %1588 = vst [vmem:[#allocation23_spill] sm:$0xff] %v1090_v36  ;;  %1589 = vst [vmem:[#allocation24_spill] sm:$0xff] %v1097_v41  ;;  %v1099_v42 = vld [vmem:[#allocation7 + $0x38] sm:$0xff]  ;;  %v1109_v50 = vld [vmem:[#allocation2 + $0x1] ss:$0 sm:$0xff]  ;;  %v138_v54 = vadd.f32 %v125_v32, %v1090_v36  ;;  %v160_v56 = vmul.f32 %v147_v34, %v1092_v37  ;;  %v131_v59 = vmul.f32 %v782_v5, %v1097_v41  ;;  %v150_v62 = vmax.f32 %v137_v40, 0.0 }
  0x54   :  { %1590 = vst [vmem:[#allocation25_spill] sm:$0xff] %v1099_v42  ;;  %1591 = vst [vmem:[#allocation26_spill] sm:$0xff] %v1104_v46  ;;  %v1111_v51 = vld [vmem:[#allocation7 + $0x48] sm:$0xff]  ;;  %v1113_v52 = vld [vmem:[#allocation7 + $0x50] sm:$0xff]  ;;  %v139_v60 = vadd.f32 %v126_v38, %v1099_v42  ;;  %v140_v61 = vadd.f32 %v127_v39, %v1101_v43  ;;  %v161_v9 = vmul.f32 %v148_v44, %v1104_v46 }
  0x55   :  { %1592 = vst [vmem:[#allocation27_spill] sm:$0xff] %v1111_v51  ;;  %v1118_v57 = vld [vmem:[#allocation7 + $0x58] sm:$0xff]  ;;  %v1120_v58 = vld [vmem:[#allocation8 + $0x20] sm:$0xff]  ;;  %v1125_v63 = vld [vmem:[#allocation7 + $0x60] sm:$0xff]  ;;  %v171_v10 = vadd.f32 %v159_v49, %v158_v45  ;;  %v198_v11 = vmul.f32 %v1109_v50, %v1038_v0  ;;  %v199_v13 = vmul.f32 %v1109_v50, %v1040_v1  ;;  %v141_v5 = vadd.f32 %v128_v47, %v1111_v51 }
  0x56   :  { %1593 = vst [vmem:[#allocation28_spill] sm:$0xff] %v1118_v57  ;;  %1594 = vst [vmem:[#allocation29_spill] sm:$0xff] %v1125_v63  ;;  %v1132_v15 = vld [vmem:[#allocation8 + $0x28] sm:$0xff]  ;;  %v142_v16 = vadd.f32 %v129_v48, %v1113_v52  ;;  %v200_v17 = vmul.f32 %v1109_v50, %v1042_v2  ;;  %v143_v18 = vadd.f32 %v130_v53, %v1118_v57  ;;  %v151_v21 = vmax.f32 %v138_v54, 0.0  ;;  %v1140_v28 = vld [vmem:[#allocation8 + $0x30] sm:$0xff] }
  0x57   :  { %1595 = vst [vmem:[#allocation30_spill] sm:$0xff] %v1132_v15  ;;  %v162_v25 = vmul.f32 %v149_v55, %v1120_v58  ;;  %v172_v27 = vadd.f32 %v171_v10, %v160_v56  ;;  %1596 = vst [vmem:[#allocation31_spill] sm:$0xff] %v1140_v28  ;;  %v144_v32 = vadd.f32 %v131_v59, %v1125_v63  ;;  %v152_v33 = vmax.f32 %v139_v60, 0.0  ;;  %v1148_v47 = vld [vmem:[#allocation8 + $0x38] sm:$0xff]  ;;  %v1150_v48 = vld [vmem:[#allocation8 + $0x40] sm:$0xff] }
  0x58   :  { %v201_v34 = vmul.f32 %v1109_v50, %v1044_v3  ;;  %v211_v38 = vadd.f32 %v198_v11, %v1048_v6  ;;  %v153_v39 = vmax.f32 %v140_v61, 0.0  ;;  %v163_v40 = vmul.f32 %v150_v62, %v1132_v15  ;;  %1597 = vst [vmem:[#allocation32_spill] sm:$0xff] %v1150_v48  ;;  %v1155_v55 = vld [vmem:[#allocation8 + $0x48] sm:$0xff]  ;;  %v1158_v62 = vld [vmem:[#allocation8 + $0x50] sm:$0xff] }
  0x59   :  { %v173_v44 = vadd.f32 %v172_v27, %v161_v9  ;;  %v212_v45 = vadd.f32 %v199_v13, %v1050_v7  ;;  %v154_v49 = vmax.f32 %v141_v5, 0.0  ;;  %v202_v53 = vmul.f32 %v1109_v50, %v1046_v4  ;;  %1598 = vst [vmem:[#allocation33_spill] sm:$0xff] %v1155_v55 }
  0x5a   :  { %v213_v54 = vadd.f32 %v200_v17, %v1052_v8  ;;  %v155_v56 = vmax.f32 %v142_v16, 0.0  ;;  %v156_v59 = vmax.f32 %v143_v18, 0.0  ;;  %v164_v60 = vmul.f32 %v151_v21, %v1140_v28  ;;  %v1165_v16 = vld [vmem:[#allocation8 + $0x58] sm:$0xff]  ;;  %v1167_v18 = vld [vmem:[#allocation8 + $0x60] sm:$0xff] }
  0x5b   :  { %v174_v61 = vadd.f32 %v173_v44, %v162_v25  ;;  %v203_v9 = vmul.f32 %v1109_v50, %v1057_v12  ;;  %v214_v10 = vadd.f32 %v201_v34, %v1060_v14  ;;  %v224_v11 = vmax.f32 %v211_v38, 0.0  ;;  %1599 = vst [vmem:[#allocation34_spill] sm:$0xff] %v1165_v16  ;;  %1600 = vst [vmem:[#allocation35_spill] sm:$0xff] %v1167_v18 }
  0x5c   :  { %v225_v13 = vmax.f32 %v212_v45, 0.0  ;;  %v157_v5 = vmax.f32 %v144_v32, 0.0  ;;  %v165_v27 = vmul.f32 %v152_v33, %v1148_v47  ;;  %v166_v17 = vmul.f32 %v153_v39, %v1150_v48 }
  0x5d   :  { %v175_v8 = vadd.f32 %v174_v61, %v163_v40  ;;  %v167_v21 = vmul.f32 %v154_v49, %v1155_v55  ;;  %v204_v25 = vmul.f32 %v1109_v50, %v1066_v19  ;;  %v215_v44 = vadd.f32 %v202_v53, %v1068_v20 }
  0x5e   :  { %v226_v34 = vmax.f32 %v213_v54, 0.0  ;;  %v168_v38 = vmul.f32 %v155_v56, %v1158_v62  ;;  %v205_v33 = vmul.f32 %v1109_v50, %v1071_v22  ;;  %v206_v39 = vmul.f32 %v1109_v50, %v1073_v23 }
  0x5f   :  { %v176_v32 = vadd.f32 %v175_v8, %v164_v60  ;;  %v216_v40 = vadd.f32 %v203_v9, %v1075_v24  ;;  %v227_v45 = vmax.f32 %v214_v10, 0.0  ;;  %v237_v49 = vmul.f32 %v224_v11, %v1078_v26  ;;  %v1189_v10 = vld [vmem:[#allocation2 + $0x2] ss:$0 sm:$0xff] }
  0x60   :  { %v238_v61 = vmul.f32 %v225_v13, %v1084_v31  ;;  %v169_v55 = vmul.f32 %v156_v59, %v1165_v16  ;;  %v170_v53 = vmul.f32 %v157_v5, %v1167_v18  ;;  %v207_v8 = vmul.f32 %v1109_v50, %v1080_v29 }
  0x61   :  { %v177_v54 = vadd.f32 %v176_v32, %v165_v27  ;;  %v208_v56 = vmul.f32 %v1109_v50, %v1082_v30  ;;  %v217_v60 = vadd.f32 %v204_v25, %v1090_v36  ;;  %v228_v23 = vmax.f32 %v215_v44, 0.0 }
  0x62   :  { %v239_v9 = vmul.f32 %v226_v34, %v1092_v37  ;;  %v209_v59 = vmul.f32 %v1109_v50, %v1088_v35  ;;  %v210_v13 = vmul.f32 %v1109_v50, %v1097_v41  ;;  %v218_v5 = vadd.f32 %v205_v33, %v1099_v42 }
  0x63   :  { %v178_v11 = vadd.f32 %v177_v54, %v166_v17  ;;  %v219_v27 = vadd.f32 %v206_v39, %v1101_v43  ;;  %v229_v32 = vmax.f32 %v216_v40, 0.0  ;;  %v240_v30 = vmul.f32 %v227_v45, %v1104_v46 }
  0x64   :  { %v250_v25 = vadd.f32 %v238_v61, %v237_v49  ;;  %v220_v34 = vadd.f32 %v207_v8, %v1111_v51  ;;  %v278_v17 = vmul.f32 %v1189_v10, %v1038_v0  ;;  %v279_v54 = vmul.f32 %v1189_v10, %v1040_v1 }
  0x65   :  { %v179_v44 = vadd.f32 %v178_v11, %v167_v21  ;;  %v221_v35 = vadd.f32 %v208_v56, %v1113_v52  ;;  %v230_v50 = vmax.f32 %v217_v60, 0.0  ;;  %v241_v33 = vmul.f32 %v228_v23, %v1120_v58 }
  0x66   :  { %v251_v41 = vadd.f32 %v250_v25, %v239_v9  ;;  %v222_v40 = vadd.f32 %v209_v59, %v1118_v57  ;;  %v223_v45 = vadd.f32 %v210_v13, %v1125_v63  ;;  %v280_v21 = vmul.f32 %v1189_v10, %v1042_v2 }
  0x67   :  { %v180_v39 = vadd.f32 %v179_v44, %v168_v38  ;;  %v231_v49 = vmax.f32 %v218_v5, 0.0  ;;  %v232_v61 = vmax.f32 %v219_v27, 0.0  ;;  %v242_v8 = vmul.f32 %v229_v32, %v1132_v15  ;;  %v1601_v32 = vld [vmem:[#allocation17_spill] sm:$0xff] }
  0x68   :  { %v252_v11 = vadd.f32 %v251_v41, %v240_v30  ;;  %v281_v56 = vmul.f32 %v1189_v10, %v1044_v3  ;;  %v291_v23 = vadd.f32 %v278_v17, %v1048_v6  ;;  %v292_v38 = vadd.f32 %v279_v54, %v1050_v7 }
  0x69   :  { %v181_v51 = vadd.f32 %v180_v39, %v169_v55  ;;  %v233_v60 = vmax.f32 %v220_v34, 0.0  ;;  %v243_v9 = vmul.f32 %v230_v50, %v1140_v28  ;;  %v282_v13 = vmul.f32 %v1189_v10, %v1046_v4 }
  0x6a   :  { %v253_v59 = vadd.f32 %v252_v11, %v241_v33  ;;  %v234_v27 = vmax.f32 %v221_v35, 0.0  ;;  %v235_v25 = vmax.f32 %v222_v40, 0.0  ;;  %v293_v30 = vadd.f32 %v280_v21, %v1601_v32  ;;  %v1602_v40 = vld [vmem:[#allocation33_spill] sm:$0xff] }
  0x6b   :  { %v182_v5 = vadd.f32 %v181_v51, %v170_v53  ;;  %v236_v41 = vmax.f32 %v223_v45, 0.0  ;;  %v244_v55 = vmul.f32 %v231_v49, %v1148_v47  ;;  %v283_v17 = vmul.f32 %v1189_v10, %v1057_v12 }
  0x6c   :  { %v254_v44 = vadd.f32 %v253_v59, %v242_v8  ;;  %v294_v34 = vadd.f32 %v281_v56, %v1060_v14  ;;  %v304_v50 = vmax.f32 %v291_v23, 0.0  ;;  %v305_v33 = vmax.f32 %v292_v38, 0.0 }
  0x6d   :  { %v183_v54 = vrot.slane %v182_v5, 4  ;;  %v245_v39 = vmul.f32 %v232_v61, %v1150_v48  ;;  %v284_v35 = vmul.f32 %v1189_v10, %v1066_v19  ;;  %v295_v51 = vadd.f32 %v282_v13, %v1068_v20 }
  0x6e   :  { %v255_v11 = vadd.f32 %v254_v44, %v243_v9  ;;  %v246_v45 = vmul.f32 %v233_v60, %v1602_v40  ;;  %v247_v21 = vmul.f32 %v234_v27, %v1158_v62  ;;  %v306_v49 = vmax.f32 %v293_v30, 0.0  ;;  %v1603_v44 = vld [vmem:[#allocation19_spill] sm:$0xff] }
  0x6f   :  { %v184_v53 = vadd.f32 %v183_v54, %v182_v5  ;;  %v248_v8 = vmul.f32 %v235_v25, %v1165_v16  ;;  %v285_v56 = vmul.f32 %v1189_v10, %v1071_v22  ;;  %v296_v61 = vadd.f32 %v283_v17, %v1075_v24  ;;  %v1246_v16 = vld [vmem:[#allocation2 + $0x3] ss:$0 sm:$0xff] }
  0x70   :  { %v256_v59 = vadd.f32 %v255_v11, %v244_v55  ;;  %v307_v38 = vmax.f32 %v294_v34, 0.0  ;;  %v317_v9 = vmul.f32 %v304_v50, %v1078_v26  ;;  %v318_v13 = vmul.f32 %v305_v33, %v1084_v31  ;;  %v1604_v11 = vld [vmem:[#allocation21_spill] sm:$0xff]  ;;  %v1605_v33 = vld [vmem:[#allocation22_spill] sm:$0xff] }
  0x71   :  { %v185_v23 = vrot.slane %v184_v53, 2  ;;  %v286_v60 = vmul.f32 %v1189_v10, %v1603_v44  ;;  %v297_v27 = vadd.f32 %v284_v35, %v1090_v36  ;;  %v308_v30 = vmax.f32 %v295_v51, 0.0 }
  0x72   :  { %v257_v5 = vadd.f32 %v256_v59, %v245_v39  ;;  %v249_v55 = vmul.f32 %v236_v41, %v1167_v18  ;;  %v287_v54 = vmul.f32 %v1189_v10, %v1080_v29  ;;  %v319_v17 = vmul.f32 %v306_v49, %v1092_v37  ;;  %v1252_v49 = vld [vmem:[%s1533_s4] sm:$0x1]  ;;  %s950_s4 = smov [#allocation10]  }
  0x73   :  { %v186_v25 = vadd.f32 %v185_v23, %v184_v53  ;;  %v288_v50 = vmul.f32 %v1189_v10, %v1604_v11  ;;  %v289_v39 = vmul.f32 %v1189_v10, %v1605_v33  ;;  %v298_v59 = vadd.f32 %v285_v56, %v1099_v42  ;;  %s757_s29 = sshll.u32 %s950_s4, 4  ;;  %s758_s29 = int_to_ptr.vmem [resolvable:$true] %s757_s29 }
  0x74   :  { %v258_v34 = vadd.f32 %v257_v5, %v246_v45  ;;  %v309_v51 = vmax.f32 %v296_v61, 0.0  ;;  %v320_v41 = vmul.f32 %v307_v38, %v1104_v46  ;;  %v330_v53 = vadd.f32 %v318_v13, %v317_v9  ;;  %v1606_v9 = vld [vmem:[#allocation24_spill] sm:$0xff]  ;;  %v1607_v46 = vld [vmem:[#allocation27_spill] sm:$0xff]  ;;  %s914_s17 = scalar_lea.vmem %s758_s29, 128  ;;  %p919_p5 = scmp.lt.s32.totalorder %s758_s29, %s758_s29 }
  0x75   :  { %v187_v35 = vrot.slane %v186_v25, 1  ;;  %v299_v23 = vadd.f32 %v286_v60, %v1101_v43  ;;  %v310_v5 = vmax.f32 %v297_v27, 0.0  ;;  %v321_v33 = vmul.f32 %v308_v30, %v1120_v58  ;;  %p915_p4 = scmp.ne.s32.totalorder %s758_s29, %s914_s17  ;;  %p920_p6 = scmp.lt.s32.totalorder %s914_s17, %s914_s17 }
  0x76   :  { %v259_v45 = vadd.f32 %v258_v34, %v247_v21  ;;  %v331_v56 = vadd.f32 %v330_v53, %v319_v17  ;;  %v358_v42 = vmul.f32 %v1246_v16, %v1038_v0  ;;  %v359_v61 = vmul.f32 %v1246_v16, %v1040_v1 }
  0x77   :  { %v188_v11 = vadd.f32 %v187_v35, %v186_v25  ;;  %v290_v13 = vmul.f32 %v1189_v10, %v1606_v9  ;;  %v300_v29 = vadd.f32 %v287_v54, %v1607_v46  ;;  %v311_v21 = vmax.f32 %v298_v59, 0.0  ;;  %p921_p7 = por %p920_p6, %p919_p5 }
  0x78   :  { %v260_v38 = vadd.f32 %v259_v45, %v248_v8  ;;  %v322_v27 = vmul.f32 %v309_v51, %v1132_v15  ;;  %v332_v30 = vadd.f32 %v331_v56, %v320_v41  ;;  %v360_v25 = vmul.f32 %v1246_v16, %v1042_v2 }
  0x79   :  { %v189_v60 = vadd.f32 %v188_v11, %v1252_v49  ;;  %v301_v34 = vadd.f32 %v288_v50, %v1113_v52  ;;  %v312_v35 = vmax.f32 %v299_v23, 0.0  ;;  %v323_v8 = vmul.f32 %v310_v5, %v1140_v28  ;;  %p922_p8 = pnand %p921_p7, %p915_p4 }
  0x7a   :  { %v261_v17 = vadd.f32 %v260_v38, %v249_v55  ;;  %v333_v53 = vadd.f32 %v332_v30, %v321_v33  ;;  %v361_v10 = vmul.f32 %v1246_v16, %v1044_v3  ;;  %v371_v54 = vadd.f32 %v358_v42, %v1048_v6 }
  0x7b   :  { %190 = vst [vmem:[#allocation10] sm:$0x1] %v189_v60  ;;  %v372_v11 = vadd.f32 %v359_v61, %v1050_v7  ;;  %v302_v51 = vadd.f32 %v289_v39, %v1118_v57  ;;  %v303_v41 = vadd.f32 %v290_v13, %v1125_v63  ;;  %v362_v55 = vmul.f32 %v1246_v16, %v1046_v4 }
  0x7c   :  { %v262_v59 = vrot.slane %v261_v17, 4  ;;  %v313_v50 = vmax.f32 %v300_v29, 0.0  ;;  %v324_v45 = vmul.f32 %v311_v21, %v1148_v47  ;;  %v334_v23 = vadd.f32 %v333_v53, %v322_v27 }
  0x7d   :  { %v373_v33 = vadd.f32 %v360_v25, %v1601_v32  ;;  %v314_v56 = vmax.f32 %v301_v34, 0.0  ;;  %v325_v42 = vmul.f32 %v312_v35, %v1150_v48  ;;  %v363_v61 = vmul.f32 %v1246_v16, %v1057_v12 }
  0x7e   :  { %v263_v5 = vadd.f32 %v262_v59, %v261_v17  ;;  %v335_v38 = vadd.f32 %v334_v23, %v323_v8  ;;  %v374_v39 = vadd.f32 %v361_v10, %v1060_v14  ;;  %v384_v13 = vmax.f32 %v371_v54, 0.0  ;;  %v1608_v23 = vld [vmem:[#allocation34_spill] sm:$0xff] }
  0x7f   :  { %v385_v60 = vmax.f32 %v372_v11, 0.0  ;;  %v315_v4 = vmax.f32 %v302_v51, 0.0  ;;  %v364_v29 = vmul.f32 %v1246_v16, %v1066_v19  ;;  %v375_v21 = vadd.f32 %v362_v55, %v1068_v20 }
  0x80   :  { %v264_v30 = vrot.slane %v263_v5, 2  ;;  %v316_v27 = vmax.f32 %v303_v41, 0.0  ;;  %v326_v25 = vmul.f32 %v313_v50, %v1602_v40  ;;  %v336_v17 = vadd.f32 %v335_v38, %v324_v45  ;;  %v1609_v38 = vld [vmem:[#allocation20_spill] sm:$0xff] }
  0x81   :  { %v386_v34 = vmax.f32 %v373_v33, 0.0  ;;  %v327_v53 = vmul.f32 %v314_v56, %v1158_v62  ;;  %v365_v8 = vmul.f32 %v1246_v16, %v1071_v22  ;;  %v376_v10 = vadd.f32 %v363_v61, %v1075_v24 }
  0x82   :  { %v265_v35 = vadd.f32 %v264_v30, %v263_v5  ;;  %v337_v54 = vadd.f32 %v336_v17, %v325_v42  ;;  %v387_v11 = vmax.f32 %v374_v39, 0.0  ;;  %v397_v59 = vmul.f32 %v384_v13, %v1078_v26  ;;  %v1610_v13 = vld [vmem:[#allocation21_spill] sm:$0xff] }
  0x83   :  { %v398_v51 = vmul.f32 %v385_v60, %v1084_v31  ;;  %v366_v41 = vmul.f32 %v1246_v16, %v1603_v44  ;;  %v377_v50 = vadd.f32 %v364_v29, %v1090_v36  ;;  %v388_v45 = vmax.f32 %v375_v21, 0.0  ;;  %v1611_v30 = vld [vmem:[#allocation25_spill] sm:$0xff]  ;;  %v1304_v44 = vld [vmem:[#allocation2 + $0x4] ss:$0 sm:$0xff] }
  0x84   :  { %v266_v55 = vrot.slane %v265_v35, 1  ;;  %v328_v33 = vmul.f32 %v315_v4, %v1608_v23  ;;  %v329_v5 = vmul.f32 %v316_v27, %v1167_v18  ;;  %v338_v56 = vadd.f32 %v337_v54, %v326_v25  ;;  %v1612_v36 = vld [vmem:[#allocation26_spill] sm:$0xff] }
  0x85   :  { %v399_v61 = vmul.f32 %v386_v34, %v1092_v37  ;;  %v367_v39 = vmul.f32 %v1246_v16, %v1609_v38  ;;  %v368_v60 = vmul.f32 %v1246_v16, %v1610_v13  ;;  %v378_v17 = vadd.f32 %v365_v8, %v1611_v30 }
  0x86   :  { %v267_v42 = vadd.f32 %v266_v55, %v265_v35  ;;  %v339_v29 = vadd.f32 %v338_v56, %v327_v53  ;;  %v389_v21 = vmax.f32 %v376_v10, 0.0  ;;  %v400_v4 = vmul.f32 %v387_v11, %v1612_v36  ;;  %v1613_v53 = vld [vmem:[#allocation22_spill] sm:$0xff] }
  0x87   :  { %v410_v23 = vadd.f32 %v398_v51, %v397_v59  ;;  %v379_v25 = vadd.f32 %v366_v41, %v1101_v43  ;;  %v390_v34 = vmax.f32 %v377_v50, 0.0  ;;  %v401_v35 = vmul.f32 %v388_v45, %v1120_v58 }
  0x88   :  { %v268_v27 = vadd.f32 %v267_v42, %v1252_v49  ;;  %v340_v54 = vadd.f32 %v339_v29, %v328_v33  ;;  %v438_v13 = vmul.f32 %v1304_v44, %v1038_v0  ;;  %v439_v8 = vmul.f32 %v1304_v44, %v1040_v1 }
  0x89   :  { %v411_v55 = vadd.f32 %v410_v23, %v399_v61  ;;  %v369_v10 = vmul.f32 %v1246_v16, %v1613_v53  ;;  %v370_v11 = vmul.f32 %v1246_v16, %v1606_v9  ;;  %v380_v59 = vadd.f32 %v367_v39, %v1607_v46 }
  0x8a   :  { %270 = vst [vmem:[#allocation10 + $0x1] sm:$0x1] %v268_v27  ;;  %v391_v51 = vmax.f32 %v378_v17, 0.0  ;;  %v341_v41 = vadd.f32 %v340_v54, %v329_v5  ;;  %v402_v50 = vmul.f32 %v389_v21, %v1132_v15  ;;  %v440_v23 = vmul.f32 %v1304_v44, %v1042_v2  ;;  %v1614_v27 = vld [vmem:[#allocation16_spill] sm:$0xff] }
  0x8b   :  { %v412_v45 = vadd.f32 %v411_v55, %v400_v4  ;;  %v381_v33 = vadd.f32 %v368_v60, %v1113_v52  ;;  %v392_v56 = vmax.f32 %v379_v25, 0.0  ;;  %v403_v61 = vmul.f32 %v390_v34, %v1140_v28 }
  0x8c   :  { %v441_v42 = vmul.f32 %v1304_v44, %v1044_v3  ;;  %v342_v29 = vrot.slane %v341_v41, 4  ;;  %v451_v39 = vadd.f32 %v438_v13, %v1048_v6  ;;  %v452_v5 = vadd.f32 %v439_v8, %v1050_v7 }
  0x8d   :  { %v413_v16 = vadd.f32 %v412_v45, %v401_v35  ;;  %v382_v17 = vadd.f32 %v369_v10, %v1118_v57  ;;  %v383_v21 = vadd.f32 %v370_v11, %v1125_v63  ;;  %v393_v4 = vmax.f32 %v380_v59, 0.0 }
  0x8e   :  { %v442_v60 = vmul.f32 %v1304_v44, %v1614_v27  ;;  %v343_v25 = vadd.f32 %v342_v29, %v341_v41  ;;  %v404_v34 = vmul.f32 %v391_v51, %v1148_v47  ;;  %v453_v55 = vadd.f32 %v440_v23, %v1601_v32 }
  0x8f   :  { %v414_v54 = vadd.f32 %v413_v16, %v402_v50  ;;  %v394_v3 = vmax.f32 %v381_v33, 0.0  ;;  %v405_v35 = vmul.f32 %v392_v56, %v1150_v48  ;;  %v443_v13 = vmul.f32 %v1304_v44, %v1057_v12 }
  0x90   :  { %v454_v8 = vadd.f32 %v441_v42, %v1060_v14  ;;  %v344_v10 = vrot.slane %v343_v25, 2  ;;  %v464_v59 = vmax.f32 %v451_v39, 0.0  ;;  %v465_v45 = vmax.f32 %v452_v5, 0.0 }
  0x91   :  { %v415_v11 = vadd.f32 %v414_v54, %v403_v61  ;;  %v395_v63 = vmax.f32 %v382_v17, 0.0  ;;  %v396_v27 = vmax.f32 %v383_v21, 0.0  ;;  %v444_v51 = vmul.f32 %v1304_v44, %v1066_v19  ;;  %v1616_v54 = vld [vmem:[#allocation19_spill] sm:$0xff] }
  0x92   :  { %v455_v41 = vadd.f32 %v442_v60, %v1068_v20  ;;  %v345_v50 = vadd.f32 %v344_v10, %v343_v25  ;;  %v406_v23 = vmul.f32 %v393_v4, %v1602_v40  ;;  %v466_v56 = vmax.f32 %v453_v55, 0.0  ;;  %v1615_v60 = vld [vmem:[#allocation34_spill] sm:$0xff] }
  0x93   :  { %v416_v33 = vadd.f32 %v415_v11, %v404_v34  ;;  %v407_v29 = vmul.f32 %v394_v3, %v1158_v62  ;;  %v445_v42 = vmul.f32 %v1304_v44, %v1071_v22  ;;  %v456_v61 = vadd.f32 %v443_v13, %v1075_v24  ;;  %v1617_v34 = vld [vmem:[#allocation23_spill] sm:$0xff] }
  0x94   :  { %v467_v16 = vmax.f32 %v454_v8, 0.0  ;;  %v346_v39 = vrot.slane %v345_v50, 1  ;;  %v477_v17 = vmul.f32 %v464_v59, %v1078_v26  ;;  %v478_v21 = vmul.f32 %v465_v45, %v1084_v31  ;;  %v1618_v8 = vld [vmem:[#allocation21_spill] sm:$0xff] }
  0x95   :  { %v417_v5 = vadd.f32 %v416_v33, %v405_v35  ;;  %v408_v25 = vmul.f32 %v395_v63, %v1615_v60  ;;  %v446_v4 = vmul.f32 %v1304_v44, %v1616_v54  ;;  %v457_v55 = vadd.f32 %v444_v51, %v1617_v34  ;;  %v1359_v33 = vld [vmem:[#allocation2 + $0x5] ss:$0 sm:$0xff] }
  0x96   :  { %v468_v3 = vmax.f32 %v455_v41, 0.0  ;;  %v347_v10 = vadd.f32 %v346_v39, %v345_v50  ;;  %v409_v11 = vmul.f32 %v396_v27, %v1167_v18  ;;  %v479_v13 = vmul.f32 %v466_v56, %v1092_v37 }
  0x97   :  { %v418_v22 = vadd.f32 %v417_v5, %v406_v23  ;;  %v447_v35 = vmul.f32 %v1304_v44, %v1609_v38  ;;  %v448_v59 = vmul.f32 %v1304_v44, %v1618_v8  ;;  %v458_v63 = vadd.f32 %v445_v42, %v1611_v30 }
  0x98   :  { %v469_v45 = vmax.f32 %v456_v61, 0.0  ;;  %v348_v51 = vadd.f32 %v347_v10, %v1252_v49  ;;  %v480_v50 = vmul.f32 %v467_v16, %v1612_v36  ;;  %v490_v27 = vadd.f32 %v478_v21, %v477_v17 }
  0x99   :  { %v419_v41 = vadd.f32 %v418_v22, %v407_v29  ;;  %v449_v23 = vmul.f32 %v1304_v44, %v1613_v53  ;;  %v459_v56 = vadd.f32 %v446_v4, %v1101_v43  ;;  %v470_v39 = vmax.f32 %v457_v55, 0.0 }
  0x9a   :  { %v481_v5 = vmul.f32 %v468_v3, %v1120_v58  ;;  %350 = vst [vmem:[#allocation10 + $0x2] sm:$0x1] %v348_v51  ;;  %v491_v42 = vadd.f32 %v490_v27, %v479_v13  ;;  %v518_v61 = vmul.f32 %v1359_v33, %v1038_v0  ;;  %v519_v22 = vmul.f32 %v1359_v33, %v1040_v1 }
  0x9b   :  { %v420_v8 = vadd.f32 %v419_v41, %v408_v25  ;;  %v450_v29 = vmul.f32 %v1304_v44, %v1606_v9  ;;  %v460_v16 = vadd.f32 %v447_v35, %v1607_v46  ;;  %v461_v17 = vadd.f32 %v448_v59, %v1113_v52  ;;  %v1619_v41 = vld [vmem:[#allocation15_spill] sm:$0xff] }
  0x9c   :  { %v471_v21 = vmax.f32 %v458_v63, 0.0  ;;  %v482_v55 = vmul.f32 %v469_v45, %v1132_v15  ;;  %v492_v3 = vadd.f32 %v491_v42, %v480_v50  ;;  %v520_v25 = vmul.f32 %v1359_v33, %v1042_v2 }
  0x9d   :  { %v421_v4 = vadd.f32 %v420_v8, %v409_v11  ;;  %v462_v10 = vadd.f32 %v449_v23, %v1118_v57  ;;  %v472_v13 = vmax.f32 %v459_v56, 0.0  ;;  %v483_v51 = vmul.f32 %v470_v39, %v1140_v28  ;;  %v1620_v8 = vld [vmem:[#allocation29_spill] sm:$0xff]  ;;  %v1621_v56 = vld [vmem:[#allocation16_spill] sm:$0xff] }
  0x9e   :  { %v521_v44 = vmul.f32 %v1359_v33, %v1619_v41  ;;  %v493_v35 = vadd.f32 %v492_v3, %v481_v5  ;;  %v531_v59 = vadd.f32 %v518_v61, %v1048_v6  ;;  %v532_v11 = vadd.f32 %v519_v22, %v1050_v7 }
  0x9f   :  { %v422_v27 = vrot.slane %v421_v4, 4  ;;  %v463_v63 = vadd.f32 %v450_v29, %v1620_v8  ;;  %v473_v45 = vmax.f32 %v460_v16, 0.0  ;;  %v474_v50 = vmax.f32 %v461_v17, 0.0 }
  0xa0   :  { %v484_v42 = vmul.f32 %v471_v21, %v1148_v47  ;;  %v494_v23 = vadd.f32 %v493_v35, %v482_v55  ;;  %v522_v39 = vmul.f32 %v1359_v33, %v1621_v56  ;;  %v533_v28 = vadd.f32 %v520_v25, %v1601_v32 }
  0xa1   :  { %v423_v15 = vadd.f32 %v422_v27, %v421_v4  ;;  %v475_v41 = vmax.f32 %v462_v10, 0.0  ;;  %v485_v5 = vmul.f32 %v472_v13, %v1150_v48  ;;  %v523_v61 = vmul.f32 %v1359_v33, %v1057_v12 }
  0xa2   :  { %v534_v22 = vadd.f32 %v521_v44, %v1060_v14  ;;  %v495_v16 = vadd.f32 %v494_v23, %v483_v51  ;;  %v544_v17 = vmax.f32 %v531_v59, 0.0  ;;  %v545_v3 = vmax.f32 %v532_v11, 0.0  ;;  %v1622_v44 = vld [vmem:[#allocation18_spill] sm:$0xff] }
  0xa3   :  { %v424_v29 = vrot.slane %v423_v15, 2  ;;  %v476_v21 = vmax.f32 %v463_v63, 0.0  ;;  %v486_v4 = vmul.f32 %v473_v45, %v1602_v40  ;;  %v487_v55 = vmul.f32 %v474_v50, %v1158_v62 }
  0xa4   :  { %v524_v25 = vmul.f32 %v1359_v33, %v1066_v19  ;;  %v496_v27 = vadd.f32 %v495_v16, %v484_v42  ;;  %v535_v13 = vadd.f32 %v522_v39, %v1068_v20  ;;  %v546_v35 = vmax.f32 %v533_v28, 0.0  ;;  %v1623_v16 = vld [vmem:[#allocation21_spill] sm:$0xff] }
  0xa5   :  { %v425_v10 = vadd.f32 %v424_v29, %v423_v15  ;;  %v488_v48 = vmul.f32 %v475_v41, %v1615_v60  ;;  %v525_v51 = vmul.f32 %v1359_v33, %v1622_v44  ;;  %v536_v59 = vadd.f32 %v523_v61, %v1075_v24 }
  0xa6   :  { %v547_v11 = vmax.f32 %v534_v22, 0.0  ;;  %v497_v45 = vadd.f32 %v496_v27, %v485_v5  ;;  %v557_v50 = vmul.f32 %v544_v17, %v1078_v26  ;;  %v558_v23 = vmul.f32 %v545_v3, %v1084_v31  ;;  %v1411_v5 = vld [vmem:[#allocation2 + $0x6] ss:$0 sm:$0xff] }
  0xa7   :  { %v426_v63 = vrot.slane %v425_v10, 1  ;;  %v489_v15 = vmul.f32 %v476_v21, %v1167_v18  ;;  %v526_v42 = vmul.f32 %v1359_v33, %v1616_v54  ;;  %v527_v28 = vmul.f32 %v1359_v33, %v1609_v38 }
  0xa8   :  { %v537_v41 = vadd.f32 %v524_v25, %v1617_v34  ;;  %v498_v29 = vadd.f32 %v497_v45, %v486_v4  ;;  %v548_v61 = vmax.f32 %v535_v13, 0.0  ;;  %v559_v22 = vmul.f32 %v546_v35, %v1092_v37 }
  0xa9   :  { %v427_v39 = vadd.f32 %v426_v63, %v425_v10  ;;  %v528_v17 = vmul.f32 %v1359_v33, %v1623_v16  ;;  %v529_v3 = vmul.f32 %v1359_v33, %v1613_v53  ;;  %v538_v21 = vadd.f32 %v525_v51, %v1611_v30 }
  0xaa   :  { %v549_v27 = vmax.f32 %v536_v59, 0.0  ;;  %v499_v18 = vadd.f32 %v498_v29, %v487_v55  ;;  %v560_v25 = vmul.f32 %v547_v11, %v1612_v36  ;;  %v570_v4 = vadd.f32 %v558_v23, %v557_v50  ;;  %v1624_v29 = vld [vmem:[#allocation30_spill] sm:$0xff] }
  0xab   :  { %v428_v38 = vadd.f32 %v427_v39, %v1252_v49  ;;  %v530_v10 = vmul.f32 %v1359_v33, %v1606_v9  ;;  %v539_v13 = vadd.f32 %v526_v42, %v1101_v43  ;;  %v598_v35 = vmul.f32 %v1411_v5, %v1038_v0 }
  0xac   :  { %v599_v63 = vmul.f32 %v1411_v5, %v1040_v1  ;;  %v500_v51 = vadd.f32 %v499_v18, %v488_v48  ;;  %v550_v59 = vmax.f32 %v537_v41, 0.0  ;;  %v561_v45 = vmul.f32 %v548_v61, %v1120_v58  ;;  %v1625_v18 = vld [vmem:[#allocation15_spill] sm:$0xff] }
  0xad   :  { %430 = vst [vmem:[#allocation10 + $0x3] sm:$0x1] %v428_v38  ;;  %v571_v55 = vadd.f32 %v570_v4, %v559_v22  ;;  %v540_v11 = vadd.f32 %v527_v28, %v1607_v46  ;;  %v541_v50 = vadd.f32 %v528_v17, %v1113_v52  ;;  %v542_v33 = vadd.f32 %v529_v3, %v1118_v57  ;;  %v1626_v17 = vld [vmem:[#allocation31_spill] sm:$0xff] }
  0xae   :  { %v600_v23 = vmul.f32 %v1411_v5, %v1042_v2  ;;  %v501_v42 = vadd.f32 %v500_v51, %v489_v15  ;;  %v551_v39 = vmax.f32 %v538_v21, 0.0  ;;  %v562_v9 = vmul.f32 %v549_v27, %v1624_v29 }
  0xaf   :  { %v572_v53 = vadd.f32 %v571_v55, %v560_v25  ;;  %v543_v48 = vadd.f32 %v530_v10, %v1620_v8  ;;  %v601_v38 = vmul.f32 %v1411_v5, %v1625_v18  ;;  %v611_v41 = vadd.f32 %v598_v35, %v1048_v6 }
  0xb0   :  { %v612_v28 = vadd.f32 %v599_v63, %v1050_v7  ;;  %v502_v61 = vrot.slane %v501_v42, 4  ;;  %v552_v22 = vmax.f32 %v539_v13, 0.0  ;;  %v563_v3 = vmul.f32 %v550_v59, %v1626_v17  ;;  %v1627_v63 = vld [vmem:[#allocation32_spill] sm:$0xff] }
  0xb1   :  { %v573_v4 = vadd.f32 %v572_v53, %v561_v45  ;;  %v553_v57 = vmax.f32 %v540_v11, 0.0  ;;  %v554_v15 = vmax.f32 %v541_v50, 0.0  ;;  %v602_v21 = vmul.f32 %v1411_v5, %v1621_v56 }
  0xb2   :  { %v613_v27 = vadd.f32 %v600_v23, %v1601_v32  ;;  %v503_v25 = vadd.f32 %v502_v61, %v501_v42  ;;  %v555_v10 = vmax.f32 %v542_v33, 0.0  ;;  %v564_v51 = vmul.f32 %v551_v39, %v1148_v47 }
  0xb3   :  { %v574_v55 = vadd.f32 %v573_v4, %v562_v9  ;;  %v603_v6 = vmul.f32 %v1411_v5, %v1057_v12  ;;  %v614_v7 = vadd.f32 %v601_v38, %v1060_v14  ;;  %v624_v13 = vmax.f32 %v611_v41, 0.0  ;;  %v1629_v4 = vld [vmem:[#allocation20_spill] sm:$0xff] }
  0xb4   :  { %v625_v35 = vmax.f32 %v612_v28, 0.0  ;;  %v504_v53 = vrot.slane %v503_v25, 2  ;;  %v565_v59 = vmul.f32 %v552_v22, %v1627_v63  ;;  %v604_v56 = vmul.f32 %v1411_v5, %v1066_v19  ;;  %v1628_v28 = vld [vmem:[#allocation35_spill] sm:$0xff] }
  0xb5   :  { %v575_v45 = vadd.f32 %v574_v55, %v563_v3  ;;  %v556_v32 = vmax.f32 %v543_v48, 0.0  ;;  %v566_v11 = vmul.f32 %v553_v57, %v1602_v40  ;;  %v615_v50 = vadd.f32 %v602_v21, %v1068_v20 }
  0xb6   :  { %v626_v9 = vmax.f32 %v613_v27, 0.0  ;;  %v505_v33 = vadd.f32 %v504_v53, %v503_v25  ;;  %v567_v12 = vmul.f32 %v554_v15, %v1158_v62  ;;  %v605_v14 = vmul.f32 %v1411_v5, %v1622_v44  ;;  %v1468_v15 = vld [vmem:[#allocation2 + $0x7] ss:$0 sm:$0xff] }
  0xb7   :  { %v576_v23 = vadd.f32 %v575_v45, %v564_v51  ;;  %v616_v42 = vadd.f32 %v603_v6, %v1075_v24  ;;  %v627_v39 = vmax.f32 %v614_v7, 0.0  ;;  %v637_v18 = vmul.f32 %v624_v13, %v1078_v26  ;;  %v1630_v13 = vld [vmem:[#allocation22_spill] sm:$0xff] }
  0xb8   :  { %v638_v19 = vmul.f32 %v625_v35, %v1084_v31  ;;  %v506_v48 = vrot.slane %v505_v33, 1  ;;  %v606_v20 = vmul.f32 %v1411_v5, %v1616_v54  ;;  %v617_v57 = vadd.f32 %v604_v56, %v1617_v34  ;;  %v1631_v35 = vld [vmem:[#allocation24_spill] sm:$0xff] }
  0xb9   :  { %v577_v38 = vadd.f32 %v576_v23, %v565_v59  ;;  %v568_v41 = vmul.f32 %v555_v10, %v1615_v60  ;;  %v569_v61 = vmul.f32 %v556_v32, %v1628_v28  ;;  %v628_v22 = vmax.f32 %v615_v50, 0.0 }
  0xba   :  { %v639_v44 = vmul.f32 %v626_v9, %v1092_v37  ;;  %v507_v24 = vadd.f32 %v506_v48, %v505_v33  ;;  %v607_v26 = vmul.f32 %v1411_v5, %v1629_v4  ;;  %v608_v31 = vmul.f32 %v1411_v5, %v1623_v16  ;;  %v797_v9 = vld [vmem:[#allocation5 + $0x18] sm:$0xff] }
  0xbb   :  { %v578_v3 = vadd.f32 %v577_v38, %v566_v11  ;;  %v618_v54 = vadd.f32 %v605_v14, %v1611_v30  ;;  %v629_v34 = vmax.f32 %v616_v42, 0.0  ;;  %v640_v21 = vmul.f32 %v627_v39, %v1612_v36  ;;  %v801_v38 = vld [vmem:[#allocation7 + $0x10] sm:$0xff] }
  0xbc   :  { %v650_v27 = vadd.f32 %v638_v19, %v637_v18  ;;  %v508_v25 = vadd.f32 %v507_v24, %v1252_v49  ;;  %v619_v37 = vadd.f32 %v606_v20, %v1101_v43  ;;  %v630_v51 = vmax.f32 %v617_v57, 0.0  ;;  %v800_v19 = vld [vmem:[#allocation5 + $0x20] sm:$0xff] }
  0xbd   :  { %v579_v10 = vadd.f32 %v578_v3, %v567_v12  ;;  %v641_v55 = vmul.f32 %v628_v22, %v1120_v58  ;;  %v678_v16 = vmul.f32 %v1468_v15, %v1038_v0  ;;  %v679_v7 = vmul.f32 %v1468_v15, %v1040_v1  ;;  %v802_v22 = vld [vmem:[#allocation5 + $0x28] sm:$0xff]  ;;  %v803_v3 = vld [vmem:[#allocation7 + $0x18] sm:$0xff] }
  0xbe   :  { %v651_v6 = vadd.f32 %v650_v27, %v639_v44  ;;  %510 = vst [vmem:[#allocation10 + $0x4] sm:$0x1] %v508_v25  ;;  %v609_v36 = vmul.f32 %v1411_v5, %v1630_v13  ;;  %v610_v53 = vmul.f32 %v1411_v5, %v1631_v35  ;;  %v620_v43 = vadd.f32 %v607_v26, %v1607_v46  ;;  %v798_v5 = vld [vmem:[#allocation7] sm:$0xff]  ;;  %v799_v46 = vld [vmem:[#allocation7 + $0x8] sm:$0xff] }
  0xbf   :  { %v580_v30 = vadd.f32 %v579_v10, %v568_v41  ;;  %v631_v59 = vmax.f32 %v618_v54, 0.0  ;;  %v642_v58 = vmul.f32 %v629_v34, %v1624_v29  ;;  %v680_v0 = vmul.f32 %v1468_v15, %v1042_v2  ;;  %v1632_v29 = vld [vmem:[#allocation28_spill] sm:$0xff]  ;;  %v804_v25 = vld [vmem:[#allocation5 + $0x30] sm:$0xff] }
  0xc0   :  { %v652_v45 = vadd.f32 %v651_v6, %v640_v21  ;;  %v621_v1 = vadd.f32 %v608_v31, %v1113_v52  ;;  %v632_v32 = vmax.f32 %v619_v37, 0.0  ;;  %v643_v11 = vmul.f32 %v630_v51, %v1626_v17  ;;  %v805_v37 = vld [vmem:[#allocation7 + $0x20] sm:$0xff]  ;;  %v807_v13 = vld [vmem:[#allocation7 + $0x28] sm:$0xff] }
  0xc1   :  { %v581_v56 = vadd.f32 %v580_v30, %v569_v61  ;;  %v681_v33 = vmul.f32 %v797_v9, %v1468_v15  ;;  %v691_v12 = vadd.f32 %v798_v5, %v678_v16  ;;  %v692_v23 = vadd.f32 %v799_v46, %v679_v7  ;;  %v806_v7 = vld [vmem:[#allocation5 + $0x38] sm:$0xff]  ;;  %v812_v5 = vld [vmem:[#allocation8 + $0x10] sm:$0xff] }
  0xc2   :  { %v653_v50 = vadd.f32 %v652_v45, %v641_v55  ;;  %v622_v42 = vadd.f32 %v609_v36, %v1632_v29  ;;  %v623_v39 = vadd.f32 %v610_v53, %v1620_v8  ;;  %v633_v2 = vmax.f32 %v620_v43, 0.0  ;;  %v808_v43 = vld [vmem:[#allocation8] sm:$0xff] }
  0xc3   :  { %v582_v14 = vrot.slane %v581_v56, 4  ;;  %v644_v18 = vmul.f32 %v631_v59, %v1148_v47  ;;  %v682_v48 = vmul.f32 %v800_v19, %v1468_v15  ;;  %v693_v20 = vadd.f32 %v801_v38, %v680_v0 }
  0xc4   :  { %v654_v52 = vadd.f32 %v653_v50, %v642_v58  ;;  %v634_v41 = vmax.f32 %v621_v1, 0.0  ;;  %v645_v61 = vmul.f32 %v632_v32, %v1627_v63  ;;  %v683_v44 = vmul.f32 %v802_v22, %v1468_v15  ;;  %v809_v58 = vld [vmem:[#allocation8 + $0x8] sm:$0xff]  ;;  %v810_v1 = vld [vmem:[#allocation5 + $0x40] sm:$0xff] }
  0xc5   :  { %v583_v57 = vadd.f32 %v582_v14, %v581_v56  ;;  %v694_v4 = vadd.f32 %v803_v3, %v681_v33  ;;  %v704_v8 = vmax.f32 %v691_v12, 0.0  ;;  %v705_v26 = vmax.f32 %v692_v23, 0.0  ;;  %v811_v50 = vld [vmem:[#allocation7 + $0x30] sm:$0xff]  ;;  %v813_v14 = vld [vmem:[#allocation5 + $0x48] sm:$0xff] }
  0xc6   :  { %v655_v24 = vadd.f32 %v654_v52, %v643_v11  ;;  %v635_v54 = vmax.f32 %v622_v42, 0.0  ;;  %v636_v34 = vmax.f32 %v623_v39, 0.0  ;;  %v646_v21 = vmul.f32 %v633_v2, %v1602_v40  ;;  %v814_v42 = vld [vmem:[#allocation7 + $0x38] sm:$0xff]  ;;  %v815_v52 = vld [vmem:[#allocation8 + $0x18] sm:$0xff] }
  0xc7   :  { %v584_v31 = vrot.slane %v583_v57, 2  ;;  %v684_v10 = vmul.f32 %v804_v25, %v1468_v15  ;;  %v695_v51 = vadd.f32 %v805_v37, %v682_v48  ;;  %v706_v55 = vmax.f32 %v693_v20, 0.0  ;;  %v816_v20 = vld [vmem:[#allocation5 + $0x50] sm:$0xff]  ;;  %v822_v37 = vld [vmem:[#allocation5 + $0x60] sm:$0xff] }
  0xc8   :  { %v656_v27 = vadd.f32 %v655_v24, %v644_v18  ;;  %v647_v16 = vmul.f32 %v634_v41, %v1158_v62  ;;  %v685_v30 = vmul.f32 %v806_v7, %v1468_v15  ;;  %v696_v36 = vadd.f32 %v807_v13, %v683_v44  ;;  %v817_v41 = vld [vmem:[#allocation7 + $0x40] sm:$0xff]  ;;  %v818_v24 = vld [vmem:[#allocation8 + $0x20] sm:$0xff] }
  0xc9   :  { %v585_v6 = vadd.f32 %v584_v31, %v583_v57  ;;  %v707_v53 = vmax.f32 %v694_v4, 0.0  ;;  %v717_v59 = vmul.f32 %v808_v43, %v704_v8  ;;  %v718_v45 = vmul.f32 %v809_v58, %v705_v26  ;;  %v819_v8 = vld [vmem:[#allocation5 + $0x58] sm:$0xff]  ;;  %v820_v31 = vld [vmem:[#allocation7 + $0x48] sm:$0xff] }
  0xca   :  { %v657_v35 = vadd.f32 %v656_v27, %v645_v61  ;;  %v648_v56 = vmul.f32 %v635_v54, %v1615_v60  ;;  %v686_v32 = vmul.f32 %v810_v1, %v1468_v15  ;;  %v697_v9 = vadd.f32 %v811_v50, %v684_v10  ;;  %v821_v27 = vld [vmem:[#allocation8 + $0x28] sm:$0xff] }
  0xcb   :  { %v586_v0 = vrot.slane %v585_v6, 1  ;;  %v708_v33 = vmax.f32 %v695_v51, 0.0  ;;  %v719_v12 = vmul.f32 %v812_v5, %v706_v55  ;;  %v649_v23 = vmul.f32 %v636_v34, %v1628_v28  ;;  %v823_v55 = vld [vmem:[#allocation7 + $0x50] sm:$0xff] }
  0xcc   :  { %v658_v11 = vadd.f32 %v657_v35, %v646_v21  ;;  %v687_v29 = vmul.f32 %v813_v14, %v1468_v15  ;;  %v698_v39 = vadd.f32 %v814_v42, %v685_v30  ;;  %v709_v18 = vmax.f32 %v696_v36, 0.0  ;;  %v824_v36 = vld [vmem:[#allocation7 + $0x58] sm:$0xff] }
  0xcd   :  { %v587_v46 = vadd.f32 %v586_v0, %v585_v6  ;;  %v720_v19 = vmul.f32 %v815_v52, %v707_v53  ;;  %v730_v48 = vadd.f32 %v718_v45, %v717_v59  ;;  %v688_v57 = vmul.f32 %v816_v20, %v1468_v15  ;;  %v825_v45 = vld [vmem:[#allocation7 + $0x60] sm:$0xff] }
  0xce   :  { %v659_v2 = vadd.f32 %v658_v11, %v647_v16  ;;  %v699_v61 = vadd.f32 %v817_v41, %v686_v32  ;;  %v710_v44 = vmax.f32 %v697_v9, 0.0  ;;  %v721_v3 = vmul.f32 %v818_v24, %v708_v33 }
  0xcf   :  { %v588_v38 = vadd.f32 %v587_v46, %v1252_v49  ;;  %v731_v4 = vadd.f32 %v730_v48, %v719_v12  ;;  %v689_v26 = vmul.f32 %v819_v8, %v1468_v15  ;;  %v700_v54 = vadd.f32 %v820_v31, %v687_v29 }
  0xd0   :  { %v660_v22 = vadd.f32 %v659_v2, %v648_v56  ;;  %v711_v21 = vmax.f32 %v698_v39, 0.0  ;;  %v722_v25 = vmul.f32 %v821_v27, %v709_v18  ;;  %v690_v51 = vmul.f32 %v822_v37, %v1468_v15 }
  0xd1   :  { %590 = vst [vmem:[#allocation10 + $0x5] sm:$0x1] %v588_v38  ;;  %v732_v10 = vadd.f32 %v731_v4, %v720_v19  ;;  %v701_v6 = vadd.f32 %v823_v55, %v688_v57  ;;  %v712_v7 = vmax.f32 %v699_v61, 0.0  ;;  %v723_v30 = vmul.f32 %v710_v44, %v1626_v17 }
  0xd2   :  { %v661_v34 = vadd.f32 %v660_v22, %v649_v23  ;;  %v702_v35 = vadd.f32 %v824_v36, %v689_v26  ;;  %v713_v43 = vmax.f32 %v700_v54, 0.0  ;;  %v724_v59 = vmul.f32 %v711_v21, %v1148_v47 }
  0xd3   :  { %v733_v13 = vadd.f32 %v732_v10, %v721_v3  ;;  %v703_v0 = vadd.f32 %v825_v45, %v690_v51  ;;  %v714_v1 = vmax.f32 %v701_v6, 0.0  ;;  %v725_v15 = vmul.f32 %v712_v7, %v1627_v63 }
  0xd4   :  { %v662_v16 = vrot.slane %v661_v34, 4  ;;  %v715_v50 = vmax.f32 %v702_v35, 0.0  ;;  %v726_v9 = vmul.f32 %v713_v43, %v1602_v40 }
  0xd5   :  { %v734_v58 = vadd.f32 %v733_v13, %v722_v25  ;;  %v716_v5 = vmax.f32 %v703_v0, 0.0  ;;  %v727_v12 = vmul.f32 %v714_v1, %v1158_v62 }
  0xd6   :  { %v663_v53 = vadd.f32 %v662_v16, %v661_v34  ;;  %v728_v47 = vmul.f32 %v715_v50, %v1615_v60 }
  0xd7   :  { %v735_v32 = vadd.f32 %v734_v58, %v723_v30  ;;  %v729_v42 = vmul.f32 %v716_v5, %v1628_v28 }
  0xd8   :  { %v664_v56 = vrot.slane %v663_v53, 2 }
  0xd9   :  { %v736_v17 = vadd.f32 %v735_v32, %v724_v59 }
  0xda   :  { %v665_v11 = vadd.f32 %v664_v56, %v663_v53 }
  0xdb   :  { %v737_v46 = vadd.f32 %v736_v17, %v725_v15 }
  0xdc   :  { %v666_v33 = vrot.slane %v665_v11, 1 }
  0xdd   :  { %v738_v14 = vadd.f32 %v737_v46, %v726_v9 }
  0xde   :  { %v667_v23 = vadd.f32 %v666_v33, %v665_v11 }
  0xdf   :  { %v739_v63 = vadd.f32 %v738_v14, %v727_v12 }
  0xe0   :  { %v668_v29 = vadd.f32 %v667_v23, %v1252_v49 }
  0xe1   :  { %v740_v39 = vadd.f32 %v739_v63, %v728_v47 }
  0xe2   :  { %670 = vst [vmem:[#allocation10 + $0x6] sm:$0x1] %v668_v29 }
  0xe3   :  { %v741_v2 = vadd.f32 %v740_v39, %v729_v42 }
  0xe5   :  { %v742_v18 = vrot.slane %v741_v2, 4 }
  0xe7   :  { %v743_v40 = vadd.f32 %v742_v18, %v741_v2 }
  0xe9   :  { %v744_v52 = vrot.slane %v743_v40, 2 }
  0xeb   :  { %v745_v19 = vadd.f32 %v744_v52, %v743_v40 }
  0xed   :  { %v746_v48 = vrot.slane %v745_v19, 1 }
  0xef   :  { %v747_v62 = vadd.f32 %v746_v48, %v745_v19 }
  0xf1   :  { %v748_v38 = vadd.f32 %v747_v62, %v1252_v49 }
  0xf3   :  { %750 = vst [vmem:[#allocation10 + $0x7] sm:$0x1] %v748_v38 }
  0xf4   :  { %925 = shalt.err (!%p922_p8)
}
  0xf5   :  { %s926_s19 = scalar_lea.hbm %s1534_s5, 128 }
  0xf6   :  { %p927_p9 = scmp.ne.s32.totalorder %s1534_s5, %s926_s19  ;;  %p930_p10 = scmp.lt.u32.totalorder %s926_s19, %s1534_s5 }
  0xf8   :  { %p932_p11 = pnand %p930_p10, %p927_p9 }
  0xfa   :  { %935 = shalt.err (!%p932_p11)
}
  0xfb   :  { %760 = dma.vmem_to_hbm [thread:$0]  %s758_s29, 128, %s1534_s5, [#allocation4]  }
  0xfc   :  { %942 = dma.done.wait [#allocation4], 128  }
  0xfd   :  { %943 = vsyncadd [#allocation4], 4294967168 }
  0xfe   :  { %764 = vsyncpa [#allocation3], 1 }
  0xff   :  { %765 = vsyncpa [#allocation6], 1 }
 0x100   :  { %766 = vsyncpa [#allocation9], 1 }
 0x101   :  { %767 = vsyncpa [#allocation4], 1 }

</bundles_post_ra>
